<compile_context>
chip_gen: v7x
topology: tpu7x:2x2x1
jax: 0.10.0
libtpu: 0.0.40
codegen_flags: <defaults>
</compile_context>

<pallas_src>
import functools

import jax
import jax.numpy as jnp
from jax.experimental import pallas as pl
from jax.experimental.pallas import tpu as pltpu


def layernorm_kernel(x_ref, a_ref, b_ref, o_ref, *, eps, feat, g):
    # x_ref: (TILE_ROWS, g*feat);  a_ref / b_ref: (1, feat)
    tile_rows = x_ref.shape[0]
    x = x_ref[...].astype(jnp.float32)
    if g > 1:
        # Segmented view: g logical rows packed along the (lane-dense) last dim.
        x = x.reshape(tile_rows, g, feat)

    # One pass: sum and sum-of-squares together (removes the serial
    # reduce -> broadcast-subtract -> reduce dependency).
    s1 = jnp.sum(x, axis=-1, keepdims=True)
    s2 = jnp.sum(x * x, axis=-1, keepdims=True)
    mean = s1 * (1.0 / feat)
    # torch.Tensor.std() default: unbiased estimator (ddof=1).
    # feat == 1 gives 0/0 = NaN, which matches PyTorch's behavior.
    var = jnp.maximum(s2 - s1 * mean, 0.0) / (feat - 1)
    # Per-row reciprocal (shape (..., 1)) instead of a full-width divide; eps is
    # added to std (NOT inside the sqrt), exactly as in the reference module.
    # approx=True would push this to the EUP; kept exact for bitwise-tight checks.
    inv = pl.reciprocal(jnp.sqrt(var) + eps, approx=False)

    a = a_ref[...].astype(jnp.float32)
    b = b_ref[...].astype(jnp.float32)
    if g > 1:
        a = a.reshape(1, 1, feat)
        b = b.reshape(1, 1, feat)

    y = (x - mean) * (inv * a) + b
    if g > 1:
        y = y.reshape(tile_rows, g * feat)
    o_ref[...] = y.astype(o_ref.dtype)


def layer_norm(x, a_2, b_2, eps=1e-6, target_block_bytes=4 << 20):
    """LayerNorm over the last dim, matching the PyTorch module exactly."""
    orig_shape = x.shape
    feat = orig_shape[-1]
    x2 = x.reshape(-1, feat)
    rows = x2.shape[0]

    # Lane packing for small feature dims: pack g rows per 128-lane row so the
    # output's last dim is a multiple of 128 (dense vst, no 75%-masked lanes).
    g = 1
    if feat < 128 and 128 % feat == 0:
        cand = 128 // feat
        if rows % cand == 0:
            g = cand
    packed_rows = rows // g
    lane_width = g * feat
    x2 = x2.reshape(packed_rows, lane_width)

    itemsize = x.dtype.itemsize
    # dtype-dependent sublane packing: f32 -> 8, bf16 -> 16, int8/fp8 -> 32.
    sublane = max(8, 32 // itemsize)

    # Mem-bound kernel: ~4 MiB input blocks amortize the ~0.35 us per-grid-step
    # overhead while (double-buffered in + out ~ 16 MiB) staying well inside
    # v7x's 64 MiB VMEM as well as v5e/v6e.
    tile_rows = max(sublane, target_block_bytes // (lane_width * itemsize))
    tile_rows = (tile_rows // sublane) * sublane
    rows_ceil = pl.cdiv(packed_rows, sublane) * sublane          # don't exceed data
    min_step_rows = pl.cdiv(pl.cdiv(packed_rows, 8), sublane) * sublane  # >=~8 steps
    tile_rows = max(sublane, min(tile_rows, rows_ceil, max(min_step_rows, sublane)))

    grid = (pl.cdiv(packed_rows, tile_rows),)

    a2d = a_2.reshape(1, feat)
    b2d = b_2.reshape(1, feat)

    kernel = functools.partial(layernorm_kernel, eps=eps, feat=feat, g=g)

    out = pl.pallas_call(
        kernel,
        out_shape=jax.ShapeDtypeStruct((packed_rows, lane_width), x.dtype),
        grid_spec=pltpu.PrefetchScalarGridSpec(
            num_scalar_prefetch=0,
            grid=grid,
            in_specs=[
                # x: row tiles. No jnp.pad: the final block may be partial; its
                # garbage rows never contaminate valid rows (reductions are
                # per-row) and their writes are masked by Pallas.
                pl.BlockSpec((tile_rows, lane_width), lambda i: (i, 0)),
                # gamma / beta: constant block index -> fetched once, stays in VMEM.
                pl.BlockSpec((1, feat), lambda i: (0, 0)),
                pl.BlockSpec((1, feat), lambda i: (0, 0)),
            ],
            out_specs=pl.BlockSpec((tile_rows, lane_width), lambda i: (i, 0)),
        ),
        compiler_params=pltpu.CompilerParams(
            dimension_semantics=("parallel",),
            # Raise scoped VMEM above the 16/32 MiB defaults so ~4 MiB blocks
            # double-buffer cleanly; 48 MiB still fits v7x's 64 MiB physical VMEM.
            vmem_limit_bytes=48 << 20,
        ),
    )(x2, a2d, b2d)

    return out.reshape(orig_shape)


if __name__ == "__main__":
    key = jax.random.PRNGKey(0)

    # Module: LayerNorm(features=32); input shaped like (batch, seq, hidden)
    batch, seq, hidden = 2, 8, 32
    x = jax.random.normal(key, (batch, seq, hidden), dtype=jnp.float32)

    # Deterministic parameter init matching nn.Parameter(torch.ones/zeros(features))
    a_2 = jnp.ones((hidden,), dtype=jnp.float32)
    b_2 = jnp.zeros((hidden,), dtype=jnp.float32)
    eps = 1e-6

    out = layer_norm(x, a_2, b_2, eps=eps)
    out = jax.block_until_ready(out)

    # Pure-JAX reference (unbiased std, eps added to std — exactly as the PyTorch module)
    mean = jnp.mean(x, axis=-1, keepdims=True)
    std = jnp.std(x, axis=-1, ddof=1, keepdims=True)
    ref = a_2 * (x - mean) / (std + eps) + b_2

    assert out.shape == x.shape and out.dtype == x.dtype
    assert jnp.allclose(out, ref, atol=1e-4, rtol=1e-4)
    print("KERNEL_OK")
</pallas_src>

<mosaic_0001>
module attributes {stable_mosaic.version = 11 : i64} {
  func.func @layernorm_kernel(%arg0: i32, %arg1: memref<8x128xf32, #tpu.memory_space<vmem>>, %arg2: memref<1x32xf32, #tpu.memory_space<vmem>>, %arg3: memref<1x32xf32, #tpu.memory_space<vmem>>, %arg4: memref<8x128xf32, #tpu.memory_space<vmem>>) attributes {dimension_semantics = [#tpu.dimension_semantics<parallel>], iteration_bounds = array<i64: 1>, scalar_prefetch = 0 : i64, scratch_operands = 0 : i64, tpu.core_type = #tpu.core_type<tc>, window_params = [{transform_indices = @transform_0, window_bounds = array<i64: 8, 128>}, {pipeline_mode = #tpu.pipeline_mode<synchronous>, transform_indices = @transform_1, window_bounds = array<i64: 1, 32>}, {pipeline_mode = #tpu.pipeline_mode<synchronous>, transform_indices = @transform_2, window_bounds = array<i64: 1, 32>}, {transform_indices = @transform_3, window_bounds = array<i64: 8, 128>}]} {
    %c0 = arith.constant 0 : index
    %c0_0 = arith.constant 0 : index
    %0 = vector.load %arg1[%c0, %c0_0] : memref<8x128xf32, #tpu.memory_space<vmem>>, vector<8x128xf32>
    %1 = vector.shape_cast %0 : vector<8x128xf32> to vector<8x4x32xf32>
    %cst = arith.constant dense<0.000000e+00> : vector<8x4xf32>
    %2 = vector.multi_reduction <add>, %1, %cst [2] : vector<8x4x32xf32> to vector<8x4xf32>
    %3 = vector.shape_cast %2 : vector<8x4xf32> to vector<8x4x1xf32>
    %4 = arith.mulf %1, %1 : vector<8x4x32xf32>
    %cst_1 = arith.constant dense<0.000000e+00> : vector<8x4xf32>
    %5 = vector.multi_reduction <add>, %4, %cst_1 [2] : vector<8x4x32xf32> to vector<8x4xf32>
    %6 = vector.shape_cast %5 : vector<8x4xf32> to vector<8x4x1xf32>
    %cst_2 = arith.constant 3.125000e-02 : f32
    %7 = vector.broadcast %cst_2 : f32 to vector<8x4x1xf32>
    %8 = arith.mulf %3, %7 : vector<8x4x1xf32>
    %9 = arith.mulf %3, %8 : vector<8x4x1xf32>
    %10 = arith.subf %6, %9 : vector<8x4x1xf32>
    %cst_3 = arith.constant 0.000000e+00 : f32
    %11 = vector.broadcast %cst_3 : f32 to vector<8x4x1xf32>
    %12 = arith.maximumf %10, %11 : vector<8x4x1xf32>
    %cst_4 = arith.constant 3.100000e+01 : f32
    %13 = vector.broadcast %cst_4 : f32 to vector<8x4x1xf32>
    %14 = arith.divf %12, %13 : vector<8x4x1xf32>
    %15 = math.sqrt %14 : vector<8x4x1xf32>
    %cst_5 = arith.constant 9.99999997E-7 : f32
    %16 = vector.broadcast %cst_5 : f32 to vector<8x4x1xf32>
    %17 = arith.addf %15, %16 : vector<8x4x1xf32>
    %18 = tpu.reciprocal %17 : vector<8x4x1xf32> -> vector<8x4x1xf32>
    %c0_6 = arith.constant 0 : index
    %c0_7 = arith.constant 0 : index
    %19 = vector.load %arg2[%c0_6, %c0_7] : memref<1x32xf32, #tpu.memory_space<vmem>>, vector<1x32xf32>
    %c0_8 = arith.constant 0 : index
    %c0_9 = arith.constant 0 : index
    %20 = vector.load %arg3[%c0_8, %c0_9] : memref<1x32xf32, #tpu.memory_space<vmem>>, vector<1x32xf32>
    %21 = vector.shape_cast %19 : vector<1x32xf32> to vector<1x1x32xf32>
    %22 = vector.shape_cast %20 : vector<1x32xf32> to vector<1x1x32xf32>
    %23 = vector.broadcast %8 : vector<8x4x1xf32> to vector<8x4x32xf32>
    %24 = arith.subf %1, %23 : vector<8x4x32xf32>
    %25 = vector.broadcast %18 : vector<8x4x1xf32> to vector<8x4x32xf32>
    %26 = vector.broadcast %21 : vector<1x1x32xf32> to vector<8x4x32xf32>
    %27 = arith.mulf %25, %26 : vector<8x4x32xf32>
    %28 = arith.mulf %24, %27 : vector<8x4x32xf32>
    %29 = vector.broadcast %22 : vector<1x1x32xf32> to vector<8x4x32xf32>
    %30 = arith.addf %28, %29 : vector<8x4x32xf32>
    %31 = vector.shape_cast %30 : vector<8x4x32xf32> to vector<8x128xf32>
    %c0_10 = arith.constant 0 : index
    %c0_11 = arith.constant 0 : index
    %32 = vector.load %arg4[%c0_10, %c0_11] : memref<8x128xf32, #tpu.memory_space<vmem>>, vector<8x128xf32>
    tpu.vector_store %arg4[%c0_10, %c0_11], %31 {strides = array<i32>} : memref<8x128xf32, #tpu.memory_space<vmem>>, vector<8x128xf32>,
    return
  }
  func.func @transform_0(%arg0: i32) -> (i32, i32) {
    %c0_i32 = arith.constant 0 : i32
    %c0_i32_0 = arith.constant 0 : i32
    return %arg0, %c0_i32 : i32, i32
  }
  func.func @transform_1(%arg0: i32) -> (i32, i32) {
    %c0_i32 = arith.constant 0 : i32
    %c0_i32_0 = arith.constant 0 : i32
    %c0_i32_1 = arith.constant 0 : i32
    return %c0_i32, %c0_i32_0 : i32, i32
  }
  func.func @transform_2(%arg0: i32) -> (i32, i32) {
    %c0_i32 = arith.constant 0 : i32
    %c0_i32_0 = arith.constant 0 : i32
    %c0_i32_1 = arith.constant 0 : i32
    return %c0_i32, %c0_i32_0 : i32, i32
  }
  func.func @transform_3(%arg0: i32) -> (i32, i32) {
    %c0_i32 = arith.constant 0 : i32
    %c0_i32_0 = arith.constant 0 : i32
    return %arg0, %c0_i32 : i32, i32
  }
}

</mosaic_0001>

<bundles_post_ra>
// kernel: tpu_custom_call.1
= control target key start
LH: loop header
LB: loop body
LE: loop exit
PB: predicated region body
PF: predicated region fallthrough
CT: control target
= control target key end

     0   :  { %8 = vsyncpa [#allocation3], 0  ;;  %s726_s0 = inlined_call_operand.hbm [shape: f32[4,128], index: 0, kind: input, shape index: {}]   ;;  %s727_s1 = inlined_call_operand.vmem [shape: f32[1,32], index: 1, kind: input, shape index: {}]   ;;  %s728_s2 = inlined_call_operand.vmem [shape: f32[1,32], index: 2, kind: input, shape index: {}]   ;;  %s729_s3 = inlined_call_operand.hbm [shape: f32[4,128], index: 3, kind: output, shape index: {}]  }
   0x1   :  { %9 = vsyncpa [#allocation4], 0 }
   0x2   :  { %14 = vsyncadd [#allocation3], 64  ;;  %s519_s12 = smov [#allocation2]   ;;  %s471_s16 = scalar_lea.hbm %s726_s0, 64 }
   0x3   :  { %s15_s13 = sshll.u32 %s519_s12, 4  ;;  %p472_p0 = scmp.ne.s32.totalorder %s726_s0, %s471_s16  ;;  %s16_s13 = int_to_ptr.vmem [resolvable:$true] %s15_s13 }
   0x4   :  { %p475_p1 = scmp.lt.u32.totalorder %s471_s16, %s726_s0 }
   0x6   :  { %p477_p2 = pnand %p475_p1, %p472_p0 }
   0x8   :  { %480 = shalt.err (!%p477_p2)
}
   0x9   :  { %s481_s21 = scalar_lea.vmem %s16_s13, 64  ;;  %s485_s22 = scalar_lea.vmem %s16_s13, 128 }
   0xa   :  { %p482_p3 = scmp.ne.s32.totalorder %s16_s13, %s481_s21  ;;  %p486_p4 = scmp.lt.s32.totalorder %s16_s13, %s16_s13 }
   0xb   :  { %p487_p5 = scmp.lt.s32.totalorder %s485_s22, %s481_s21 }
   0xd   :  { %p488_p6 = por %p487_p5, %p486_p4 }
   0xf   :  { %p489_p7 = pnand %p488_p6, %p482_p3 }
  0x11   :  { %492 = shalt.err (!%p489_p7)
}
  0x12   :  { %s520_s23 = smov 64   ;;  %s521_s24 = smov 4  }
  0x13   :  { %21 = dma.hbm_to_vmem [thread:$0]  %s726_s0, 64, %s16_s13, [#allocation3], %s520_s23, %s520_s23, %s521_s24  }
  0x14   :  { %515 = dma.done.wait [#allocation3], 128  }
  0x15   :  { %516 = vsyncadd [#allocation3], 4294967168  ;;  %v29_v0 = vld [vmem:[#allocation2] sm:$0xff]  ;;  %s522_s27 = smov 32   ;;  %s523_s28 = smov 96   ;;  %v45_v3 = vlaneseq  ;;  %vm108_vm0 = vcmask 257024  }
  0x16   :  { %37 = vrot.lane.b32.xlu1 %v29_v0, %s522_s27  ;;  %31 = vrot.lane.b32.xlu0 %v29_v0, %s523_s28  ;;  %v524_v1 = vmov 1983009808   ;;  %v525_v4 = vmov 1934713408   ;;  %v526_v31 = vmov 0.0  }
  0x17   :  { %v43_v2 = vunpack.c.l.s4 %v524_v1  ;;  %v75_v5 = vunpack.c.l.s4 %v525_v4  ;;  %v46_v7 = vshrl.u32 %v45_v3, 7 }
  0x19   :  { %v44_v6 = vunpack.c.0.s8 %v43_v2  ;;  %v76_v10 = vunpack.c.0.s8 %v75_v5 }
  0x1a   :  { %34 = vrot.lane.b32.xlu0 %v29_v0, %s520_s23 }
  0x1b   :  { %v566_v11 = vsub.s32 %v44_v6, %v46_v7  ;;  %v568_v17 = vsub.s32 %v76_v10, %v46_v7 }
  0x88   :  { %v38_v8 = vpop.permute.xlu1 %37  ;;  %v32_v9 = vpop.permute.xlu0 %31 }
  0x89   :  { %v56_v12 = vcombine.low %v32_v9, %v38_v8  ;;  %v57_v13 = vcombine.high %v32_v9, %v38_v8 }
  0x8b   :  { %v64_v18 = vrot.slane %v56_v12, %v566_v11  ;;  %v71_v19 = vrot.slane %v57_v13, %v566_v11 }
  0x8c   :  { %v35_v14 = vpop.permute.xlu0 %34 }
  0x8d   :  { %v40_v15 = vcombine.low %v29_v0, %v35_v14  ;;  %v41_v16 = vcombine.high %v29_v0, %v35_v14 }
  0x8f   :  { %v48_v20 = vrot.slane %v40_v15, %v566_v11  ;;  %v55_v21 = vrot.slane %v41_v16, %v566_v11 }
  0x91   :  { %v72_v22 = vcombine.low %v48_v20, %v64_v18  ;;  %v73_v23 = vcombine.high %v48_v20, %v64_v18  ;;  %v88_v24 = vcombine.low %v55_v21, %v71_v19  ;;  %v89_v27 = vcombine.high %v55_v21, %v71_v19 }
  0x93   :  { %v575_v25 = vrot.slane %v72_v22, %v568_v17  ;;  %v578_v26 = vrot.slane %v73_v23, %v568_v17  ;;  %v581_v28 = vrot.slane %v88_v24, %v568_v17  ;;  %v591_v33 = vrot.slane %v89_v27, %v568_v17 }
  0x95   :  { %v115_v29 = vsel %vm108_vm0, %v578_v26, 0.0  ;;  %v109_v30 = vsel %vm108_vm0, %v575_v25, 0.0  ;;  %v588_v32 = vcombine.high %v578_v26, %v526_v31  ;;  %v121_v34 = vsel %vm108_vm0, %v581_v28, 0.0 }
  0x96   :  { %116 = vadd.xlane.f32.xlu0 %v115_v29  ;;  %110 = vadd.xlane.f32.xlu1 %v109_v30  ;;  %v598_v36 = vcombine.high %v581_v28, %v526_v31  ;;  %v127_v37 = vsel %vm108_vm0, %v591_v33, 0.0  ;;  %v605_v39 = vcombine.high %v591_v33, %v526_v31  ;;  %v608_v40 = vcombine.high %v575_v25, %v526_v31 }
  0x97   :  { %v118_v35 = vsel %vm108_vm0, %v588_v32, 0.0  ;;  %v133_v44 = vmul.f32 %v575_v25, %v575_v25  ;;  %v136_v47 = vmul.f32 %v588_v32, %v588_v32  ;;  %v135_v48 = vmul.f32 %v578_v26, %v578_v26 }
  0x98   :  { %v124_v38 = vsel %vm108_vm0, %v598_v36, 0.0  ;;  %v130_v41 = vsel %vm108_vm0, %v605_v39, 0.0  ;;  %v112_v42 = vsel %vm108_vm0, %v608_v40, 0.0  ;;  %v134_v43 = vmul.f32 %v608_v40, %v608_v40 }
  0x99   :  { %v141_v46 = vsel %vm108_vm0, %v133_v44, 0.0  ;;  %v150_v49 = vsel %vm108_vm0, %v136_v47, 0.0  ;;  %v147_v50 = vsel %vm108_vm0, %v135_v48, 0.0  ;;  %v138_v51 = vmul.f32 %v598_v36, %v598_v36 }
  0x9a   :  { %122 = vadd.xlane.f32.xlu0 %v121_v34  ;;  %119 = vadd.xlane.f32.xlu1 %v118_v35  ;;  %v144_v45 = vsel %vm108_vm0, %v134_v43, 0.0  ;;  %v137_v52 = vmul.f32 %v581_v28, %v581_v28  ;;  %v140_v55 = vmul.f32 %v605_v39, %v605_v39  ;;  %v139_v56 = vmul.f32 %v591_v33, %v591_v33 }
  0x9b   :  { %v156_v53 = vsel %vm108_vm0, %v138_v51, 0.0 }
  0x9c   :  { %v153_v54 = vsel %vm108_vm0, %v137_v52, 0.0  ;;  %v162_v57 = vsel %vm108_vm0, %v140_v55, 0.0  ;;  %v159_v58 = vsel %vm108_vm0, %v139_v56, 0.0 }
  0x9e   :  { %128 = vadd.xlane.f32.xlu0 %v127_v37  ;;  %125 = vadd.xlane.f32.xlu1 %v124_v38 }
  0xa2   :  { %131 = vadd.xlane.f32.xlu1 %v130_v41  ;;  %113 = vadd.xlane.f32.xlu0 %v112_v42 }
  0xa6   :  { %145 = vadd.xlane.f32.xlu1 %v144_v45  ;;  %142 = vadd.xlane.f32.xlu0 %v141_v46 }
  0xaa   :  { %151 = vadd.xlane.f32.xlu1 %v150_v49  ;;  %148 = vadd.xlane.f32.xlu0 %v147_v50 }
  0xae   :  { %157 = vadd.xlane.f32.xlu1 %v156_v53  ;;  %154 = vadd.xlane.f32.xlu0 %v153_v54 }
  0xb2   :  { %163 = vadd.xlane.f32.xlu1 %v162_v57  ;;  %160 = vadd.xlane.f32.xlu0 %v159_v58 }
 0x123   :  { %v117_v59 = vpop.xlane.xlu0 %116  ;;  %v111_v60 = vpop.xlane.xlu1 %110 }
 0x124   :  { %v638_v1 = vmul.f32 0.03125, %v111_v60  ;;  %v642_v5 = vmul.f32 0.03125, %v117_v59 }
 0x126   :  { %v173_v6 = vmul.f32 %v638_v1, %v111_v60  ;;  %v175_v14 = vmul.f32 %v642_v5, %v117_v59 }
 0x127   :  { %v123_v61 = vpop.xlane.xlu0 %122  ;;  %v120_v62 = vpop.xlane.xlu1 %119 }
 0x128   :  { %v645_v7 = vmul.f32 0.03125, %v120_v62  ;;  %v649_v15 = vmul.f32 0.03125, %v123_v61 }
 0x12a   :  { %v176_v16 = vmul.f32 %v645_v7, %v120_v62  ;;  %v177_v30 = vmul.f32 %v649_v15, %v123_v61 }
 0x12b   :  { %v129_v63 = vpop.xlane.xlu0 %128  ;;  %v126_v0 = vpop.xlane.xlu1 %125 }
 0x12c   :  { %v652_v18 = vmul.f32 0.03125, %v126_v0  ;;  %v656_v34 = vmul.f32 0.03125, %v129_v63 }
 0x12e   :  { %v178_v31 = vmul.f32 %v652_v18, %v126_v0  ;;  %v179_v51 = vmul.f32 %v656_v34, %v129_v63 }
 0x12f   :  { %v132_v2 = vpop.xlane.xlu1 %131  ;;  %v114_v3 = vpop.xlane.xlu0 %113 }
 0x130   :  { %v640_v4 = vmul.f32 0.03125, %v114_v3  ;;  %v658_v35 = vmul.f32 0.03125, %v132_v2 }
 0x132   :  { %v174_v8 = vmul.f32 %v640_v4, %v114_v3  ;;  %v180_v52 = vmul.f32 %v658_v35, %v132_v2 }
 0x133   :  { %v146_v9 = vpop.xlane.xlu1 %145  ;;  %v143_v10 = vpop.xlane.xlu0 %142 }
 0x134   :  { %v182_v12 = vsub.f32 %v146_v9, %v174_v8  ;;  %v181_v13 = vsub.f32 %v143_v10, %v173_v6 }
 0x136   :  { %v190_v19 = vmax.f32 %v182_v12, 0.0  ;;  %v189_v20 = vmax.f32 %v181_v13, 0.0 }
 0x137   :  { %v152_v21 = vpop.xlane.xlu1 %151  ;;  %v149_v22 = vpop.xlane.xlu0 %148 }
 0x138   :  { %v199_v23 = vmul.f32 0.032258064, %v190_v19  ;;  %v198_v24 = vmul.f32 0.032258064, %v189_v20  ;;  %v184_v27 = vsub.f32 %v152_v21, %v176_v16  ;;  %v183_v29 = vsub.f32 %v149_v22, %v175_v14 }
 0x13a   :  { %439 = vrsqrt.f32 %v199_v23  ;;  %v192_v41 = vmax.f32 %v184_v27, 0.0  ;;  %v191_v42 = vmax.f32 %v183_v29, 0.0  ;;  %vm215_vm1 = vcmp.eq.f32.partialorder %v199_v23, inf }
 0x13b   :  { %441 = vrsqrt.f32 %v198_v24  ;;  %v158_v37 = vpop.xlane.xlu1 %157  ;;  %v155_v38 = vpop.xlane.xlu0 %154  ;;  %v218_v60 = vand.u32 2147483648, %v199_v23  ;;  %vm217_vm2 = vcmp.eq.f32.partialorder %v199_v23, 0.0  ;;  %vm208_vm3 = vcmp.eq.f32.partialorder %v198_v24, inf }
 0x13c   :  { %v186_v43 = vsub.f32 %v158_v37, %v178_v31  ;;  %v185_v44 = vsub.f32 %v155_v38, %v177_v30  ;;  %v201_v45 = vmul.f32 0.032258064, %v192_v41  ;;  %v200_v46 = vmul.f32 0.032258064, %v191_v42 }
 0x13d   :  { %v211_v2 = vand.u32 2147483648, %v198_v24  ;;  %vm210_vm4 = vcmp.eq.f32.partialorder %v198_v24, 0.0 }
 0x13e   :  { %v194_v47 = vmax.f32 %v186_v43, 0.0  ;;  %v193_v48 = vmax.f32 %v185_v44, 0.0  ;;  %443 = vrsqrt.f32 %v201_v45  ;;  %vm229_vm5 = vcmp.eq.f32.partialorder %v201_v45, inf }
 0x13f   :  { %v164_v49 = vpop.xlane.xlu1 %163  ;;  %v161_v50 = vpop.xlane.xlu0 %160  ;;  %445 = vrsqrt.f32 %v200_v46  ;;  %vm231_vm6 = vcmp.eq.f32.partialorder %v201_v45, 0.0  ;;  %v232_v20 = vand.u32 2147483648, %v201_v45  ;;  %vm222_vm7 = vcmp.eq.f32.partialorder %v200_v46, inf }
 0x140   :  { %v203_v53 = vmul.f32 0.032258064, %v194_v47  ;;  %v662_v54 = vmul.f32 0.032258064, %v193_v48  ;;  %v188_v55 = vsub.f32 %v164_v49, %v180_v52  ;;  %v187_v56 = vsub.f32 %v161_v50, %v179_v51 }
 0x141   :  { %vm224_vm8 = vcmp.eq.f32.partialorder %v200_v46, 0.0 }
 0x142   :  { %447 = vrsqrt.f32 %v203_v53  ;;  %v196_v62 = vmax.f32 %v188_v55, 0.0  ;;  %v195_v63 = vmax.f32 %v187_v56, 0.0  ;;  %vm243_vm9 = vcmp.eq.f32.partialorder %v203_v53, inf }
 0x143   :  { %449 = vrsqrt.f32 %v662_v54  ;;  %vm245_vm10 = vcmp.eq.f32.partialorder %v203_v53, 0.0  ;;  %v246_v42 = vand.u32 2147483648, %v203_v53  ;;  %vm236_vm11 = vcmp.eq.f32.partialorder %v662_v54, inf }
 0x144   :  { %v440_v57 = vpop.eup %439  ;;  %v205_v8 = vmul.f32 0.032258064, %v196_v62  ;;  %v665_v10 = vmul.f32 0.032258064, %v195_v63  ;;  %vm238_vm12 = vcmp.eq.f32.partialorder %v662_v54, 0.0 }
 0x145   :  { %v442_v58 = vpop.eup %441  ;;  %v214_v59 = vmul.f32 %v440_v57, %v199_v23 }
 0x146   :  { %v207_v61 = vmul.f32 %v442_v58, %v198_v24  ;;  %451 = vrsqrt.f32 %v205_v8  ;;  %vm257_vm13 = vcmp.eq.f32.partialorder %v205_v8, inf  ;;  %v260_v55 = vand.u32 2147483648, %v205_v8 }
 0x147   :  { %v216_v0 = vsel %vm215_vm1, %v199_v23, %v214_v59  ;;  %v225_v23 = vand.u32 2147483648, %v200_v46  ;;  %453 = vrsqrt.f32 %v665_v10  ;;  %vm259_vm14 = vcmp.eq.f32.partialorder %v205_v8, 0.0 }
 0x148   :  { %v219_v3 = vsel %vm217_vm2, %v218_v60, %v216_v0  ;;  %v209_v6 = vsel %vm208_vm3, %v198_v24, %v207_v61  ;;  %v444_v12 = vpop.eup %443  ;;  %vm250_vm15 = vcmp.eq.f32.partialorder %v665_v10, inf  ;;  %vm252_vm0 = vcmp.eq.f32.partialorder %v665_v10, 0.0 }
 0x149   :  { %v212_v9 = vsel %vm210_vm4, %v211_v2, %v209_v6  ;;  %v446_v13 = vpop.eup %445  ;;  %v263_v14 = vadd.f32 1e-06, %v219_v3  ;;  %v228_v16 = vmul.f32 %v444_v12, %v201_v45  ;;  %v428_v3 = vld [vmem:[%s727_s1] ss:$0 sm:$0xff]  ;;  %vm404_vm1 = vcmask 261120  }
 0x14a   :  { %v262_v19 = vadd.f32 1e-06, %v212_v9  ;;  %v221_v21 = vmul.f32 %v446_v13, %v200_v46  ;;  %v282_v13 = vsub.f32 %v578_v26, %v642_v5  ;;  %v285_v26 = vsub.f32 %v598_v36, %v652_v18 }
 0x14b   :  { %v230_v22 = vsel %vm229_vm5, %v201_v45, %v228_v16  ;;  %455 = vrcp.f32 %v263_v14  ;;  %v239_v45 = vand.u32 2147483648, %v662_v54  ;;  %v283_v14 = vsub.f32 %v588_v32, %v645_v7  ;;  %v429_v32 = vld [vmem:[%s728_s2] ss:$0 sm:$0xff] }
 0x14c   :  { %v448_v24 = vpop.eup %447  ;;  %v233_v27 = vsel %vm231_vm6, %v232_v20, %v230_v22  ;;  %v223_v29 = vsel %vm222_vm7, %v200_v46, %v221_v21  ;;  %457 = vrcp.f32 %v262_v19  ;;  %v280_v19 = vsub.f32 %v575_v25, %v638_v1 }
 0x14d   :  { %v450_v30 = vpop.eup %449  ;;  %v265_v31 = vadd.f32 1e-06, %v233_v27  ;;  %v226_v37 = vsel %vm224_vm8, %v225_v23, %v223_v29  ;;  %v242_v38 = vmul.f32 %v448_v24, %v203_v53  ;;  %v281_v20 = vsub.f32 %v608_v40, %v640_v4 }
 0x14e   :  { %v264_v41 = vadd.f32 1e-06, %v226_v37  ;;  %v235_v43 = vmul.f32 %v450_v30, %v662_v54  ;;  %v287_v40 = vsub.f32 %v605_v39, %v658_v35  ;;  %v286_v36 = vsub.f32 %v591_v33, %v656_v34 }
 0x14f   :  { %459 = vrcp.f32 %v265_v31  ;;  %v244_v44 = vsel %vm243_vm9, %v203_v53, %v242_v38  ;;  %v284_v31 = vsub.f32 %v581_v28, %v649_v15  ;;  %vm406_vm2 = vcmask 523264  }
 0x150   :  { %461 = vrcp.f32 %v264_v41  ;;  %v247_v46 = vsel %vm245_vm10, %v246_v42, %v244_v44  ;;  %v237_v47 = vsel %vm236_vm11, %v662_v54, %v235_v43  ;;  %v452_v50 = vpop.eup %451  ;;  %v253_v54 = vand.u32 2147483648, %v665_v10 }
 0x151   :  { %v267_v48 = vadd.f32 1e-06, %v247_v46  ;;  %v240_v49 = vsel %vm238_vm12, %v239_v45, %v237_v47  ;;  %v256_v52 = vmul.f32 %v452_v50, %v205_v8  ;;  %v454_v56 = vpop.eup %453  ;;  %vm408_vm3 = vcmask 785408  }
 0x152   :  { %v266_v51 = vadd.f32 1e-06, %v240_v49  ;;  %v249_v58 = vmul.f32 %v454_v56, %v665_v10 }
 0x153   :  { %463 = vrcp.f32 %v267_v48  ;;  %v258_v53 = vsel %vm257_vm13, %v205_v8, %v256_v52 }
 0x154   :  { %465 = vrcp.f32 %v266_v51  ;;  %v261_v57 = vsel %vm259_vm14, %v260_v55, %v258_v53  ;;  %v251_v62 = vsel %vm250_vm15, %v665_v10, %v249_v58 }
 0x155   :  { %v456_v59 = vpop.eup %455  ;;  %v269_v60 = vadd.f32 1e-06, %v261_v57  ;;  %v254_v0 = vsel %vm252_vm0, %v253_v54, %v251_v62 }
 0x156   :  { %v458_v61 = vpop.eup %457  ;;  %v268_v6 = vadd.f32 1e-06, %v254_v0  ;;  %v295_v16 = vmul.f32 %v456_v59, %v428_v3 }
 0x157   :  { %467 = vrcp.f32 %v269_v60  ;;  %v294_v10 = vmul.f32 %v458_v61, %v428_v3 }
 0x158   :  { %469 = vrcp.f32 %v268_v6  ;;  %v303_v29 = vmul.f32 %v295_v16, %v281_v20 }
 0x159   :  { %v460_v63 = vpop.eup %459  ;;  %v302_v27 = vmul.f32 %v294_v10, %v280_v19 }
 0x15a   :  { %v462_v2 = vpop.eup %461  ;;  %v297_v9 = vmul.f32 %v460_v63, %v428_v3  ;;  %v317_v38 = vadd.f32 %v429_v32, %v303_v29 }
 0x15b   :  { %v296_v8 = vmul.f32 %v462_v2, %v428_v3  ;;  %v316_v37 = vadd.f32 %v429_v32, %v302_v27 }
 0x15c   :  { %v305_v22 = vmul.f32 %v297_v9, %v283_v14 }
 0x15d   :  { %v464_v12 = vpop.eup %463  ;;  %v304_v21 = vmul.f32 %v296_v8, %v282_v13 }
 0x15e   :  { %v466_v23 = vpop.eup %465  ;;  %v299_v24 = vmul.f32 %v464_v12, %v428_v3  ;;  %v319_v25 = vadd.f32 %v429_v32, %v305_v22 }
 0x15f   :  { %v298_v7 = vmul.f32 %v466_v23, %v428_v3  ;;  %v318_v30 = vadd.f32 %v429_v32, %v304_v21 }
 0x160   :  { %v307_v4 = vmul.f32 %v299_v24, %v285_v26  ;;  %v332_v45 = vcombine.low %v317_v38, %v319_v25 }
 0x161   :  { %v468_v5 = vpop.eup %467  ;;  %v306_v43 = vmul.f32 %v298_v7, %v284_v31  ;;  %v324_v44 = vcombine.low %v316_v37, %v318_v30 }
 0x162   :  { %v301_v1 = vmul.f32 %v468_v5, %v428_v3  ;;  %v470_v41 = vpop.eup %469  ;;  %v321_v46 = vadd.f32 %v429_v32, %v307_v4  ;;  %v339_v28 = vrot.slane %v332_v45, %v566_v11 }
 0x163   :  { %v300_v42 = vmul.f32 %v470_v41, %v428_v3  ;;  %v320_v35 = vadd.f32 %v429_v32, %v306_v43  ;;  %v331_v50 = vrot.slane %v324_v44, %v566_v11 }
 0x164   :  { %v309_v18 = vmul.f32 %v301_v1, %v287_v40 }
 0x165   :  { %v308_v48 = vmul.f32 %v300_v42, %v286_v36  ;;  %v357_v34 = vcombine.high %v331_v50, %v339_v28  ;;  %v356_v52 = vcombine.low %v331_v50, %v339_v28 }
 0x166   :  { %v323_v47 = vadd.f32 %v429_v32, %v309_v18 }
 0x167   :  { %v322_v49 = vadd.f32 %v429_v32, %v308_v48  ;;  %v371_v53 = vrot.slane %v357_v34, %v568_v17  ;;  %v364_v58 = vrot.slane %v356_v52, %v568_v17 }
 0x168   :  { %v348_v39 = vcombine.low %v321_v46, %v323_v47 }
 0x169   :  { %v340_v15 = vcombine.low %v320_v35, %v322_v49 }
 0x16a   :  { %v355_v51 = vrot.slane %v348_v39, %v566_v11 }
 0x16b   :  { %v347_v33 = vrot.slane %v340_v15, %v566_v11 }
 0x16d   :  { %v373_v55 = vcombine.high %v347_v33, %v355_v51  ;;  %v372_v56 = vcombine.low %v347_v33, %v355_v51 }
 0x16f   :  { %v387_v57 = vrot.slane %v373_v55, %v568_v17  ;;  %v380_v59 = vrot.slane %v372_v56, %v568_v17 }
 0x171   :  { %v390_v60 = vcombine.low %v371_v53, %v387_v57  ;;  %v389_v54 = vcombine.high %v364_v58, %v380_v59  ;;  %v388_v61 = vcombine.low %v364_v58, %v380_v59  ;;  %v391_v11 = vcombine.high %v371_v53, %v387_v57 }
 0x173   :  { %397 = vrot.lane.b32.xlu1 %v390_v60, %s520_s23  ;;  %393 = vrot.lane.b32.xlu0 %v389_v54, %s522_s27 }
 0x177   :  { %401 = vrot.lane.b32.xlu1 %v391_v11, %s523_s28 }
 0x1e5   :  { %v398_v62 = vpop.permute.xlu1 %397  ;;  %v394_v63 = vpop.permute.xlu0 %393 }
 0x1e6   :  { %v405_v0 = vsel %vm404_vm1, %v388_v61, %v394_v63 }
 0x1e7   :  { %v407_v3 = vsel %vm406_vm2, %v405_v0, %v398_v62 }
 0x1e9   :  { %v402_v2 = vpop.permute.xlu1 %401 }
 0x1ea   :  { %v409_v6 = vsel %vm408_vm3, %v407_v3, %v402_v2 }
 0x1eb   :  { %410 = vst [vmem:[#allocation5] sm:$0xff] %v409_v6 }
 0x1ec   :  { %415 = vsyncadd [#allocation4], 64  ;;  %s527_s2 = smov [#allocation5]  }
 0x1ed   :  { %s416_s4 = sshll.u32 %s527_s2, 4  ;;  %s417_s4 = int_to_ptr.vmem [resolvable:$true] %s416_s4 }
 0x1ee   :  { %s493_s5 = scalar_lea.vmem %s417_s4, 64  ;;  %s497_s6 = scalar_lea.vmem %s417_s4, 128 }
 0x1ef   :  { %p494_p8 = scmp.ne.s32.totalorder %s417_s4, %s493_s5  ;;  %p498_p9 = scmp.lt.s32.totalorder %s417_s4, %s417_s4 }
 0x1f0   :  { %p499_p10 = scmp.lt.s32.totalorder %s497_s6, %s493_s5 }
 0x1f2   :  { %p500_p11 = por %p499_p10, %p498_p9 }
 0x1f4   :  { %p501_p12 = pnand %p500_p11, %p494_p8 }
 0x1f6   :  { %504 = shalt.err (!%p501_p12)
}
 0x1f7   :  { %s505_s9 = scalar_lea.hbm %s729_s3, 64 }
 0x1f8   :  { %p506_p13 = scmp.ne.s32.totalorder %s729_s3, %s505_s9  ;;  %p509_p0 = scmp.lt.u32.totalorder %s505_s9, %s729_s3 }
 0x1fa   :  { %p511_p1 = pnand %p509_p0, %p506_p13 }
 0x1fc   :  { %514 = shalt.err (!%p511_p1)
}
 0x1fd   :  { %422 = dma.vmem_to_hbm [thread:$0]  %s417_s4, 64, %s729_s3, [#allocation4], %s520_s23, %s520_s23, %s521_s24  }
 0x1fe   :  { %517 = dma.done.wait [#allocation4], 128  }
 0x1ff   :  { %518 = vsyncadd [#allocation4], 4294967168 }
 0x200   :  { %426 = vsyncpa [#allocation3], 1 }
 0x201   :  { %427 = vsyncpa [#allocation4], 1 }

</bundles_post_ra>
